<compile_context>
chip_gen: v5e
topology: v5e:2x2
jax: 0.10.0
libtpu: 0.0.40
codegen_flags: <defaults>
</compile_context>

<pallas_src>
import functools

import jax
import jax.numpy as jnp
from jax import lax
from jax.experimental import pallas as pl
from jax.experimental.pallas import tpu as pltpu


def _round_up(x, m):
    return (x + m - 1) // m * m


def ner_kernel(tok_ref, m_ref, b_ref, out_ref, *, n_ctx):
    """Fused embedding-lookup + linear via one offset-one-hot matmul.

    tok_ref : (TN, n_ctx)     int32  -- token ids already offset by p*(V+1) per column
    m_ref   : (W_pad, C_pad)  float32 -- stacked pre-projected tables (VMEM-resident)
    b_ref   : (1, C_pad)      float32
    out_ref : (TN, C_pad)     float32
    """
    tok = tok_ref[...]                                   # (TN, n_ctx)
    n = tok.shape[0]
    w = m_ref.shape[0]

    # One hoisted iota; n_ctx cheap integer compares OR'ed (position blocks are disjoint,
    # so OR == sum), then a single bool->f32 cast.
    iota = lax.broadcasted_iota(jnp.int32, (n, w), 1)    # (TN, W_pad)
    hit = iota == tok[:, 0:1]
    for p in range(1, n_ctx):
        hit = jnp.logical_or(hit, iota == tok[:, p:p + 1])
    onehot = hit.astype(jnp.float32)                     # (TN, W_pad)

    # Single MXU matmul: (TN, W_pad) @ (W_pad, C_pad), plus broadcast bias.
    out_ref[...] = (
        jnp.dot(onehot, m_ref[...], preferred_element_type=jnp.float32)
        + b_ref[...]
    )


@jax.jit
def ner_forward(tokens, emb_table, weight, bias):
    """Pallas equivalent of NERModel.forward (tokens: (N, 5) int32)."""
    n, n_ctx = tokens.shape
    v1, e = emb_table.shape                   # v1 = vocab_size + 1
    c = weight.shape[0]

    # ---- wrapper-side algebra (constant-folded / hoisted under jit) ----
    # Per-position projected tables: M_p = emb_table @ W_p^T, each (V+1, C), stacked.
    w3 = weight.astype(jnp.float32).reshape(c, n_ctx, e)                  # (C, n_ctx, E)
    stacked = jnp.einsum("ve,cpe->pvc", emb_table.astype(jnp.float32), w3)
    stacked = stacked.reshape(n_ctx * v1, c)                              # (n_ctx*(V+1), C)

    # Pad rows to a multiple of 8 (sublane) and cols to 128 (lane-dense output).
    w_rows = n_ctx * v1
    w_pad = _round_up(w_rows, 8)
    c_pad = _round_up(c, 128)
    stacked = jnp.pad(stacked, ((0, w_pad - w_rows), (0, c_pad - c)))
    b2 = jnp.pad(bias.astype(jnp.float32).reshape(1, c), ((0, 0), (0, c_pad - c)))

    # Pre-offset token ids: column p indexes block p of the stacked table.
    offsets = (jnp.arange(n_ctx, dtype=jnp.int32) * v1)[None, :]          # (1, n_ctx)

    # Batch tiling: pipeline tokens-in / output-out DMAs behind the matmul.
    tn = min(256, _round_up(n, 8))
    n_pad = _round_up(n, tn)
    tok_p = jnp.pad(tokens.astype(jnp.int32), ((0, n_pad - n), (0, 0))) + offsets
    n_blocks = n_pad // tn

    kernel = functools.partial(ner_kernel, n_ctx=n_ctx)

    cost = pl.CostEstimate(
        flops=2 * n_pad * w_pad * c_pad,
        transcendentals=0,
        bytes_accessed=(tok_p.size * 4 + stacked.size * 4 + b2.size * 4
                        + n_pad * c_pad * 4),
    )

    out_padded = pl.pallas_call(
        kernel,
        out_shape=jax.ShapeDtypeStruct((n_pad, c_pad), jnp.float32),
        grid_spec=pltpu.PrefetchScalarGridSpec(
            num_scalar_prefetch=0,
            grid=(n_blocks,),
            in_specs=[
                pl.BlockSpec((tn, n_ctx), lambda i: (i, 0)),        # tokens: batch-blocked
                pl.BlockSpec((w_pad, c_pad), lambda i: (0, 0)),     # stacked weight: resident
                pl.BlockSpec((1, c_pad), lambda i: (0, 0)),         # bias: resident
            ],
            out_specs=pl.BlockSpec((tn, c_pad), lambda i: (i, 0)),
        ),
        compiler_params=pltpu.CompilerParams(
            dimension_semantics=("parallel",),
        ),
        cost_estimate=cost,
    )(tok_p, stacked, b2)

    return out_padded[:n, :c]


def reference_forward(tokens, emb_table, weight, bias):
    """Plain-JAX reference matching the PyTorch forward."""
    n = tokens.shape[0]
    emb = emb_table[tokens]                    # (N, 5, E)
    flat = emb.reshape(n, -1)                  # (N, 5*E)
    return flat @ weight.T + bias              # (N, C)


if __name__ == "__main__":
    # Small shapes consistent with NERModel defaults.
    vocab_size = 30
    n_class = 8
    emb_size = 50
    n_ctx = 5
    batch = 8

    key = jax.random.PRNGKey(0)
    k_emb, k_w, k_b, k_tok = jax.random.split(key, 4)

    # nn.Embedding(vocab_size + 1, emb_size): weights ~ N(0, 1)
    emb_table = jax.random.normal(k_emb, (vocab_size + 1, emb_size), dtype=jnp.float32)

    # nn.Linear(emb_size * 5, n_class): U(-1/sqrt(fan_in), 1/sqrt(fan_in))
    fan_in = emb_size * n_ctx
    bound = 1.0 / jnp.sqrt(jnp.float32(fan_in))
    weight = jax.random.uniform(k_w, (n_class, fan_in), minval=-bound, maxval=bound,
                                dtype=jnp.float32)
    bias = jax.random.uniform(k_b, (n_class,), minval=-bound, maxval=bound,
                              dtype=jnp.float32)

    # token ids in [0, vocab_size]
    tokens = jax.random.randint(k_tok, (batch, n_ctx), 0, vocab_size + 1, dtype=jnp.int32)

    out = ner_forward(tokens, emb_table, weight, bias)
    out = jax.block_until_ready(out)

    ref = reference_forward(tokens, emb_table, weight, bias)
    assert out.shape == (batch, n_class)
    assert jnp.allclose(out, ref, rtol=1e-5, atol=1e-5), "Pallas output mismatch vs reference"

    print("KERNEL_OK")
</pallas_src>

<mosaic_0001>
module attributes {stable_mosaic.version = 11 : i64} {
  func.func @ner_kernel(%arg0: i32, %arg1: memref<8x5xi32, #tpu.memory_space<vmem>>, %arg2: memref<160x128xf32, #tpu.memory_space<vmem>>, %arg3: memref<1x128xf32, #tpu.memory_space<vmem>>, %arg4: memref<8x128xf32, #tpu.memory_space<vmem>>) attributes {dimension_semantics = [#tpu.dimension_semantics<parallel>], iteration_bounds = array<i64: 1>, scalar_prefetch = 0 : i64, scratch_operands = 0 : i64, tpu.core_type = #tpu.core_type<tc>, window_params = [{transform_indices = @transform_0, window_bounds = array<i64: 8, 5>}, {pipeline_mode = #tpu.pipeline_mode<synchronous>, transform_indices = @transform_1, window_bounds = array<i64: 160, 128>}, {pipeline_mode = #tpu.pipeline_mode<synchronous>, transform_indices = @transform_2, window_bounds = array<i64: 1, 128>}, {transform_indices = @transform_3, window_bounds = array<i64: 8, 128>}]} {
    %c0 = arith.constant 0 : index
    %c0_0 = arith.constant 0 : index
    %0 = vector.load %arg1[%c0, %c0_0] : memref<8x5xi32, #tpu.memory_space<vmem>>, vector<8x5xi32>
    %1 = tpu.iota {dimensions = array<i32: 1>} : vector<8x160xi32>
    %2 = vector.extract_strided_slice %0 {offsets = [0, 0], sizes = [8, 1], strides = [1, 1]} : vector<8x5xi32> to vector<8x1xi32>
    %3 = vector.broadcast %2 : vector<8x1xi32> to vector<8x160xi32>
    %4 = arith.cmpi eq, %1, %3 : vector<8x160xi32>
    %5 = vector.extract_strided_slice %0 {offsets = [0, 1], sizes = [8, 1], strides = [1, 1]} : vector<8x5xi32> to vector<8x1xi32>
    %6 = vector.broadcast %5 : vector<8x1xi32> to vector<8x160xi32>
    %7 = arith.cmpi eq, %1, %6 : vector<8x160xi32>
    %8 = arith.ori %4, %7 : vector<8x160xi1>
    %9 = vector.extract_strided_slice %0 {offsets = [0, 2], sizes = [8, 1], strides = [1, 1]} : vector<8x5xi32> to vector<8x1xi32>
    %10 = vector.broadcast %9 : vector<8x1xi32> to vector<8x160xi32>
    %11 = arith.cmpi eq, %1, %10 : vector<8x160xi32>
    %12 = arith.ori %8, %11 : vector<8x160xi1>
    %13 = vector.extract_strided_slice %0 {offsets = [0, 3], sizes = [8, 1], strides = [1, 1]} : vector<8x5xi32> to vector<8x1xi32>
    %14 = vector.broadcast %13 : vector<8x1xi32> to vector<8x160xi32>
    %15 = arith.cmpi eq, %1, %14 : vector<8x160xi32>
    %16 = arith.ori %12, %15 : vector<8x160xi1>
    %17 = vector.extract_strided_slice %0 {offsets = [0, 4], sizes = [8, 1], strides = [1, 1]} : vector<8x5xi32> to vector<8x1xi32>
    %18 = vector.broadcast %17 : vector<8x1xi32> to vector<8x160xi32>
    %19 = arith.cmpi eq, %1, %18 : vector<8x160xi32>
    %20 = arith.ori %16, %19 : vector<8x160xi1>
    %21 = arith.extui %20 : vector<8x160xi1> to vector<8x160xi32>
    %22 = arith.sitofp %21 : vector<8x160xi32> to vector<8x160xf32>
    %c0_1 = arith.constant 0 : index
    %c0_2 = arith.constant 0 : index
    %23 = vector.load %arg2[%c0_1, %c0_2] : memref<160x128xf32, #tpu.memory_space<vmem>>, vector<160x128xf32>
    %cst = arith.constant dense<0.000000e+00> : vector<8x128xf32>
    %24 = tpu.matmul %22, %23, %cst {dimension_numbers = #tpu.dot_dimension_numbers<[1], [0], [0], [1], [0, 0, 1, 1], [], []>} : vector<8x160xf32>, vector<160x128xf32>, vector<8x128xf32> -> vector<8x128xf32>
    %c0_3 = arith.constant 0 : index
    %c0_4 = arith.constant 0 : index
    %25 = vector.load %arg3[%c0_3, %c0_4] : memref<1x128xf32, #tpu.memory_space<vmem>>, vector<1x128xf32>
    %26 = vector.broadcast %25 : vector<1x128xf32> to vector<8x128xf32>
    %27 = arith.addf %24, %26 : vector<8x128xf32>
    %c0_5 = arith.constant 0 : index
    %c0_6 = arith.constant 0 : index
    %28 = vector.load %arg4[%c0_5, %c0_6] : memref<8x128xf32, #tpu.memory_space<vmem>>, vector<8x128xf32>
    tpu.vector_store %arg4[%c0_5, %c0_6], %27 {strides = array<i32>} : memref<8x128xf32, #tpu.memory_space<vmem>>, vector<8x128xf32>,
    return
  }
  func.func @transform_0(%arg0: i32) -> (i32, i32) {
    %c0_i32 = arith.constant 0 : i32
    %c0_i32_0 = arith.constant 0 : i32
    return %arg0, %c0_i32 : i32, i32
  }
  func.func @transform_1(%arg0: i32) -> (i32, i32) {
    %c0_i32 = arith.constant 0 : i32
    %c0_i32_0 = arith.constant 0 : i32
    %c0_i32_1 = arith.constant 0 : i32
    return %c0_i32, %c0_i32_0 : i32, i32
  }
  func.func @transform_2(%arg0: i32) -> (i32, i32) {
    %c0_i32 = arith.constant 0 : i32
    %c0_i32_0 = arith.constant 0 : i32
    %c0_i32_1 = arith.constant 0 : i32
    return %c0_i32, %c0_i32_0 : i32, i32
  }
  func.func @transform_3(%arg0: i32) -> (i32, i32) {
    %c0_i32 = arith.constant 0 : i32
    %c0_i32_0 = arith.constant 0 : i32
    return %arg0, %c0_i32 : i32, i32
  }
}

</mosaic_0001>

<bundles_post_ra>
// kernel: ner_forward.1
= control target key start
LH: loop header
LB: loop body
LE: loop exit
PB: predicated region body
PF: predicated region fallthrough
CT: control target
= control target key end

     0   :  { %v184_v2 = vmov 0   ;;  %v185_v3 = vmov 2   ;;  %v186_v5 = vmov 4   ;;  %s280_s0 = inlined_call_operand.vmem [shape: s32[8,5], index: 0, kind: input, shape index: {}]   ;;  %s281_s1 = inlined_call_operand.vmem [shape: f32[160,128], index: 1, kind: input, shape index: {}]   ;;  %s282_s2 = inlined_call_operand.vmem [shape: f32[1,128], index: 2, kind: input, shape index: {}]   ;;  %s283_s3 = inlined_call_operand.hbm [shape: f32[8,128], index: 3, kind: output, shape index: {}]  }
   0x1   :  { %v15_v0 = vld [vmem:[%s280_s0] sm:$0xff]  ;;  %v71_v1 = vld [vmem:[%s281_s1 + $0x78] sm:$0xff]  ;;  %151 = vset.pattern.permute.xlu0 %v184_v2  ;;  %153 = vset.pattern.permute.xlu1 %v185_v3  ;;  %v70_v4 = vld [vmem:[%s281_s1 + $0x70] sm:$0xff] }
   0x2   :  { %20 = vperm.xlu0 %151, %v15_v0   ;;  %32 = vperm.xlu1 %153, %v15_v0  }
   0x3   :  { %155 = vset.pattern.permute.xlu2 %v186_v5  ;;  %84 = vmatpush.msra.mxu0 %v71_v1 }
   0x4   :  { %8 = vsyncpa [#allocation3], 0  ;;  %46 = vperm.xlu2 %155, %v15_v0   ;;  %v69_v6 = vld [vmem:[%s281_s1 + $0x68] sm:$0xff]  ;;  %v68_v7 = vld [vmem:[%s281_s1 + $0x60] sm:$0xff]  ;;  %v187_v9 = vmov 1   ;;  %v188_v10 = vmov 3   ;;  %v16_v26 = vlaneseq }
   0x5   :  { %85 = vmatpush.msra.mxu0 %v70_v4  ;;  %v67_v8 = vld [vmem:[%s281_s1 + $0x58] sm:$0xff]  ;;  %v66_v11 = vld [vmem:[%s281_s1 + $0x50] sm:$0xff]  ;;  %v65_v12 = vld [vmem:[%s281_s1 + $0x48] sm:$0xff]  ;;  %v189_v34 = vmov 0.0   ;;  %s190_s26 = smov [#allocation2]   ;;  %s132_s30 = sshll.u32 %s283_s3, 4  ;;  %s133_s30 = int_to_ptr.hbm [resolvable:$true] %s132_s30 }
   0x6   :  { %v64_v13 = vld [vmem:[%s281_s1 + $0x40] sm:$0xff]  ;;  %v63_v14 = vld [vmem:[%s281_s1 + $0x38] sm:$0xff]  ;;  %v62_v15 = vld [vmem:[%s281_s1 + $0x30] sm:$0xff]  ;;  %v17_v29 = vand.u32 127, %v16_v26  ;;  %s130_s27 = sshll.u32 %s190_s26, 4  ;;  %s131_s27 = int_to_ptr.vmem [resolvable:$true] %s130_s27 }
   0x7   :  { %86 = vmatpush.msra.mxu0 %v69_v6  ;;  %v61_v16 = vld [vmem:[%s281_s1 + $0x28] sm:$0xff]  ;;  %v75_v17 = vld [vmem:[%s281_s1 + $0x98] sm:$0xff]  ;;  %v60_v18 = vld [vmem:[%s281_s1 + $0x20] sm:$0xff] }
   0x8   :  { %116 = vmatpush.msra.mxu1 %v75_v17  ;;  %v59_v19 = vld [vmem:[%s281_s1 + $0x18] sm:$0xff]  ;;  %v58_v20 = vld [vmem:[%s281_s1 + $0x10] sm:$0xff]  ;;  %v57_v22 = vld [vmem:[%s281_s1 + $0x8] sm:$0xff]  ;;  %v18_v30 = vadd.s32 128, %v17_v29 }
   0x9   :  { %87 = vmatpush.msra.mxu0 %v68_v7  ;;  %v74_v21 = vld [vmem:[%s281_s1 + $0x90] sm:$0xff]  ;;  %v73_v23 = vld [vmem:[%s281_s1 + $0x88] sm:$0xff]  ;;  %v56_v24 = vld [vmem:[%s281_s1] sm:$0xff] }
   0xa   :  { %152 = vset.pattern.permute.xlu0 %v187_v9  ;;  %154 = vset.pattern.permute.xlu1 %v188_v10  ;;  %v72_v25 = vld [vmem:[%s281_s1 + $0x80] sm:$0xff] }
   0xb   :  { %25 = vperm.xlu0 %152, %v15_v0   ;;  %39 = vperm.xlu1 %154, %v15_v0   ;;  %v157_v37 = vld [vmem:[%s282_s2] ss:$0 sm:$0xff] }
   0xc   :  { %88 = vmatpush.msra.mxu0 %v67_v8  ;;  %117 = vmatpush.msra.mxu1 %v74_v21 }
   0xe   :  { %89 = vmatpush.msra.mxu0 %v66_v11  ;;  %118 = vmatpush.msra.mxu1 %v73_v23 }
  0x10   :  { %90 = vmatpush.msra.mxu0 %v65_v12  ;;  %119 = vmatpush.msra.mxu1 %v72_v25 }
  0x12   :  { %91 = vmatpush.msra.mxu0 %v64_v13 }
  0x13   :  { %156 = vset.pattern.permute.xlu0 %v186_v5 }
  0x14   :  { %92 = vmatpush.msra.mxu0 %v63_v14 }
  0x16   :  { %93 = vmatpush.msra.mxu0 %v62_v15 }
  0x18   :  { %94 = vmatpush.msra.mxu0 %v61_v16 }
  0x1a   :  { %95 = vmatpush.msra.mxu0 %v60_v18 }
  0x1c   :  { %96 = vmatpush.msra.mxu0 %v59_v19 }
  0x1e   :  { %97 = vmatpush.msra.mxu0 %v58_v20 }
  0x20   :  { %98 = vmatpush.msra.mxu0 %v57_v22 }
  0x22   :  { %99 = vmatpush.msra.mxu0 %v56_v24 }
  0x5e   :  { %v47_v33 = vpop.permute.xlu2 %46 }
  0x5f   :  { %vm49_vm12 = vcmp.eq.s32.totalorder %v18_v30, %v47_v33  ;;  %vm48_vm14 = vcmp.eq.s32.totalorder %v17_v29, %v47_v33 }
  0x74   :  { %v21_v27 = vpop.permute.xlu0 %20  ;;  %v33_v28 = vpop.permute.xlu1 %32 }
  0x75   :  { %vm22_vm0 = vcmp.eq.s32.totalorder %v17_v29, %v21_v27  ;;  %vm23_vm3 = vcmp.eq.s32.totalorder %v18_v30, %v21_v27  ;;  %vm34_vm5 = vcmp.eq.s32.totalorder %v17_v29, %v33_v28  ;;  %vm35_vm8 = vcmp.eq.s32.totalorder %v18_v30, %v33_v28 }
  0x7d   :  { %v26_v31 = vpop.permute.xlu0 %25  ;;  %v40_v32 = vpop.permute.xlu1 %39 }
  0x7e   :  { %vm27_vm1 = vcmp.eq.s32.totalorder %v17_v29, %v26_v31  ;;  %vm28_vm2 = vcmp.eq.s32.totalorder %v18_v30, %v26_v31  ;;  %vm41_vm7 = vcmp.eq.s32.totalorder %v17_v29, %v40_v32  ;;  %vm42_vm10 = vcmp.eq.s32.totalorder %v18_v30, %v40_v32 }
  0x7f   :  { %vm29_vm4 = vmor %vm22_vm0, %vm27_vm1  ;;  %vm80_vm0 = vcmask 261120  }
  0x80   :  { %vm30_vm6 = vmor %vm23_vm3, %vm28_vm2 }
  0x81   :  { %vm36_vm9 = vmor %vm29_vm4, %vm34_vm5 }
  0x82   :  { %vm37_vm11 = vmor %vm30_vm6, %vm35_vm8 }
  0x83   :  { %vm43_vm13 = vmor %vm36_vm9, %vm41_vm7 }
  0x84   :  { %vm44_vm15 = vmor %vm37_vm11, %vm42_vm10 }
  0x85   :  { %vm51_vm1 = vmor %vm44_vm15, %vm49_vm12 }
  0x86   :  { %vm50_vm2 = vmor %vm43_vm13, %vm48_vm14  ;;  %v142_v35 = vsel %vm51_vm1, 1.0, %v189_v34 }
  0x87   :  { %v141_v36 = vsel %vm50_vm2, 1.0, %v189_v34  ;;  %143 = vmatmul.msk.f32.vlgmr.msra.gmra.mxu1 %vm80_vm0, %v142_v35 }
  0x88   :  { %100 = vmatmul.f32.vlgmr.msra.gmra.mxu0 %v141_v36 }
 0x104   :  { %v121_v40 = vpop.f32.mrf.mxu1 }
 0x105   :  { %v101_v38 = vpop.f32.mrf.mxu0 }
 0x106   :  { %v102_v39 = vadd.f32 %v157_v37, %v101_v38 }
 0x108   :  { %v122_v41 = vadd.f32 %v121_v40, %v102_v39 }
 0x10a   :  { %124 = vst [vmem:[#allocation2] sm:$0xff] %v122_v41 }
 0x10b   :  { %135 = dma.vmem_to_hbm [thread:$0]  %s131_s27, 128, %s133_s30, [#allocation3]  }
 0x10c   :  { %182 = dma.done.wait [#allocation3], 128  }
 0x10d   :  { %183 = vsyncadd [#allocation3], 4294967168 }
 0x10e   :  { %140 = vsyncpa [#allocation3], 1 }

</bundles_post_ra>
